<compile_context>
chip_gen: v5e
topology: v5e:2x2
jax: 0.10.0
libtpu: 0.0.40
codegen_flags: <defaults>
</compile_context>

<pallas_src>
import functools

import jax
import jax.numpy as jnp
from jax import lax
from jax.experimental import pallas as pl
from jax.experimental.pallas import tpu as pltpu

_LANES = 128
_SUBLANES = 8
_CHUNK = _LANES * _SUBLANES          # 1024 elements per (8, 128) vreg-shaped chunk
_SUB_CHUNKS = 8                      # chunks per fused inner-loop iteration (8 f32 vregs/input)
_BLOCK_BYTES = 2 * 1024 * 1024       # ~2 MiB of HBM per input per grid step, any dtype


def _partial_sums_kernel(pre_ref, pos_ref, neg_ref, acc_ref, *,
                         block_chunks, steps_per_shard, valid_chunks,
                         first_masked_block, needs_mask):
    """Accumulate the five global partial sums into a lane-resident (5, 8, 128) block."""
    s = pl.program_id(0)   # shard axis ("parallel" -> split across TensorCores when >1 TC)
    i = pl.program_id(1)   # reduction axis ("arbitrary")

    @pl.when(i == 0)
    def _init():
        acc_ref[...] = jnp.zeros_like(acc_ref)

    blk = s * steps_per_shard + i   # logical block id (used for boundary/overshoot masking)

    def accumulate(masked):
        zero = jnp.zeros((_SUBLANES, _LANES), jnp.float32)

        def partial(start, size, carry):
            # Load each (size, 8, 128) chunk of p/q/n exactly once, do 5 MACs (pure VPU).
            a_pq, a_pn, a_pp, a_qq, a_nn = carry
            sl = pl.ds(start, size)
            p = pre_ref[sl, :, :].astype(jnp.float32)
            q = pos_ref[sl, :, :].astype(jnp.float32)
            n = neg_ref[sl, :, :].astype(jnp.float32)
            if masked:
                cid = (blk * block_chunks + start
                       + lax.broadcasted_iota(jnp.int32, (size, _SUBLANES, _LANES), 0))
                m = cid < valid_chunks
                fzero = jnp.float32(0.0)
                p = jnp.where(m, p, fzero)
                q = jnp.where(m, q, fzero)
                n = jnp.where(m, n, fzero)
            a_pq = a_pq + jnp.sum(p * q, axis=0)   # sum(pre * pos)
            a_pn = a_pn + jnp.sum(p * n, axis=0)   # sum(pre * neg)
            a_pp = a_pp + jnp.sum(p * p, axis=0)   # sum(pre^2)
            a_qq = a_qq + jnp.sum(q * q, axis=0)   # sum(pos^2)
            a_nn = a_nn + jnp.sum(n * n, axis=0)   # sum(neg^2)
            return (a_pq, a_pn, a_pp, a_qq, a_nn)

        carry = (zero, zero, zero, zero, zero)
        n_full = block_chunks // _SUB_CHUNKS
        rem = block_chunks - n_full * _SUB_CHUNKS
        if n_full > 0:
            unroll = 1
            for u in (8, 4, 2):
                if n_full % u == 0:
                    unroll = u
                    break

            def body(j, c):
                start = pl.multiple_of(j * _SUB_CHUNKS, _SUB_CHUNKS)
                return partial(start, _SUB_CHUNKS, c)

            carry = lax.fori_loop(0, n_full, body, carry, unroll=unroll)
        if rem > 0:   # static remainder when block_chunks is not a multiple of _SUB_CHUNKS
            carry = partial(n_full * _SUB_CHUNKS, rem, carry)

        a_pq, a_pn, a_pp, a_qq, a_nn = carry
        acc_ref[0] += a_pq
        acc_ref[1] += a_pn
        acc_ref[2] += a_pp
        acc_ref[3] += a_qq
        acc_ref[4] += a_nn

    if needs_mask:
        # Only the boundary / overshoot blocks pay for the iota + selects.
        @pl.when(blk >= first_masked_block)
        def _boundary():
            accumulate(masked=True)

        @pl.when(blk < first_masked_block)
        def _steady():
            accumulate(masked=False)
    else:
        accumulate(masked=False)


def _tensorcores_per_chip():
    """TensorCores per chip that Mosaic can split a 'parallel' grid axis across."""
    try:
        kind = jax.devices()[0].device_kind.lower()
    except Exception:
        return 1
    if "v7" in kind or "v4" in kind or "v5p" in kind:
        return 2
    return 1


def _tail_partial_sums(p, q, n):
    """Five partial sums of a small ragged tail (<1024 elems), in plain JAX f32."""
    p = p.astype(jnp.float32)
    q = q.astype(jnp.float32)
    n = n.astype(jnp.float32)
    return jnp.stack([jnp.sum(p * q), jnp.sum(p * n),
                      jnp.sum(p * p), jnp.sum(q * q), jnp.sum(n * n)])


def cl_loss(pre, pos, neg, t: float = 1.0):
    assert pre.shape == pos.shape == neg.shape
    assert pre.dtype == pos.dtype == neg.dtype
    total = pre.size
    itemsize = jnp.dtype(pre.dtype).itemsize

    n_chunks = total // _CHUNK           # 1024-aligned prefix -> zero-copy (n,8,128) view
    main_elems = n_chunks * _CHUNK
    tail_elems = total - main_elems

    # Ragged tail (<1024 elements per input): reduce in the wrapper, negligible cost.
    if tail_elems:
        tail_sums = _tail_partial_sums(pre.reshape(-1)[main_elems:],
                                       pos.reshape(-1)[main_elems:],
                                       neg.reshape(-1)[main_elems:])
    else:
        tail_sums = jnp.zeros((5,), jnp.float32)

    if n_chunks == 0:
        sums = tail_sums
    else:
        if tail_elems:
            # TODO(synk): the prefix slice still costs one extra pass over the data for
            #             awkward totals; a lane-level in-kernel mask over a (rows,128)
            #             view could remove even that copy.
            def prep(x):
                return x.reshape(-1)[:main_elems].reshape(n_chunks, _SUBLANES, _LANES)
        else:
            def prep(x):   # pure reshape, no copy, native dtype
                return x.reshape(n_chunks, _SUBLANES, _LANES)

        pre3, pos3, neg3 = prep(pre), prep(pos), prep(neg)

        # ~2 MiB of HBM per input per grid step regardless of dtype (512 f32 / 1024 bf16 chunks).
        max_block_chunks = max(_SUB_CHUNKS, _BLOCK_BYTES // (_CHUNK * itemsize))
        block_chunks = min(n_chunks, max_block_chunks)
        total_blocks = pl.cdiv(n_chunks, block_chunks)

        n_shards = 2 if (_tensorcores_per_chip() >= 2 and total_blocks >= 2) else 1
        steps = pl.cdiv(total_blocks, n_shards)
        overshoot = (n_shards * steps) != total_blocks
        last_partial = (n_chunks % block_chunks) != 0
        needs_mask = overshoot or last_partial
        first_masked_block = total_blocks - 1 if last_partial else total_blocks

        if overshoot:
            def in_map(s, i):
                # Overshoot steps re-read the last real block; they are fully masked in-kernel.
                return (jnp.minimum(s * steps + i, total_blocks - 1), 0, 0)
        else:
            def in_map(s, i):
                return (s * steps + i, 0, 0)

        in_spec = pl.BlockSpec((block_chunks, _SUBLANES, _LANES), in_map)
        # Output block is the per-shard accumulator: same block across the reduction axis (P3).
        out_spec = pl.BlockSpec((None, 5, _SUBLANES, _LANES), lambda s, i: (s, 0, 0, 0))

        kernel = functools.partial(
            _partial_sums_kernel,
            block_chunks=block_chunks,
            steps_per_shard=steps,
            valid_chunks=n_chunks,
            first_masked_block=first_masked_block,
            needs_mask=needs_mask,
        )

        cost = pl.CostEstimate(
            flops=10 * main_elems,
            transcendentals=0,
            bytes_accessed=3 * main_elems * itemsize + n_shards * 5 * _CHUNK * 4,
        )

        partials = pl.pallas_call(
            kernel,
            out_shape=jax.ShapeDtypeStruct((n_shards, 5, _SUBLANES, _LANES), jnp.float32),
            grid_spec=pltpu.PrefetchScalarGridSpec(
                num_scalar_prefetch=0,
                grid=(n_shards, steps),
                in_specs=[in_spec, in_spec, in_spec],
                out_specs=out_spec,
            ),
            compiler_params=pltpu.CompilerParams(
                # TODO(synk): on v7x, verify in an xprof trace that both TensorCores each
                #             stream ~half the blocks; force pltpu.CORE_PARALLEL if not.
                dimension_semantics=("parallel", "arbitrary"),
                vmem_limit_bytes=32 * 1024 * 1024,   # 12 MiB DB inputs fit even on v5e
            ),
            cost_estimate=cost,
        )(pre3, pos3, neg3)

        # Tiny final combine (5 * n_shards * 1024 floats -> 5 scalars) + ragged tail.
        sums = jnp.sum(partials, axis=(0, 2, 3)) + tail_sums     # (5,)

    dot_pq, dot_pn = sums[0], sums[1]
    mag_p = jnp.sqrt(sums[2])
    mag_q = jnp.sqrt(sums[3])
    mag_n = jnp.sqrt(sums[4])
    cos_pq = dot_pq / (mag_p * mag_q)
    cos_pn = dot_pn / (mag_p * mag_n)
    # -log(N/(N+D)) with N=exp(cos_pq/t), D=exp(cos_pn/t), in numerically stable form.
    loss = jax.nn.softplus((cos_pn - cos_pq) / jnp.float32(t))
    return loss.reshape(1).astype(jnp.float32)


def _reference(pre, pos, neg, t=1.0):
    def mag(x):
        return jnp.sqrt(jnp.sum(x.astype(jnp.float32) ** 2))

    def cos(x, y):
        return jnp.sum(x.astype(jnp.float32) * y.astype(jnp.float32)) / (mag(x) * mag(y))

    N = jnp.exp(cos(pre, pos) / t)
    D = jnp.exp(cos(pre, neg) / t)
    return (-jnp.log(N / (N + D))).reshape(1)


if __name__ == "__main__":
    key = jax.random.PRNGKey(0)

    def run_check(idx, shape, t=1.0, dtype=jnp.float32, tol=1e-5):
        k = jax.random.fold_in(key, idx)
        k1, k2, k3 = jax.random.split(k, 3)
        pre = jax.random.normal(k1, shape, dtype=jnp.float32).astype(dtype)
        pos = jax.random.normal(k2, shape, dtype=jnp.float32).astype(dtype)
        neg = jax.random.normal(k3, shape, dtype=jnp.float32).astype(dtype)
        out = cl_loss(pre, pos, neg, t=t)
        jax.block_until_ready(out)
        ref = _reference(pre, pos, neg, t=t)
        assert out.shape == (1,), out.shape
        assert jnp.allclose(out, ref, rtol=tol, atol=tol), (shape, dtype, out, ref)

    # Primary small NCHW-like case (what the module's forward implies).
    run_check(0, (2, 4, 16, 16), t=1.0)
    # Awkward total (not a multiple of 1024) -> kernel prefix + wrapper ragged tail, no pad.
    run_check(1, (3, 5, 7, 11), t=1.0)
    # Larger case -> multi-block grid, gated boundary-block masking, possible 2-TC split.
    run_check(2, (4, 8, 125, 200), t=0.5)
    # bf16 inputs -> dtype-scaled block size, per-chunk f32 cast inside the fused pass.
    run_check(3, (2, 8, 64, 64), t=1.0, dtype=jnp.bfloat16, tol=1e-4)

    print("KERNEL_OK")
</pallas_src>

<mosaic_0001>
module attributes {stable_mosaic.version = 11 : i64} {
  func.func @_partial_sums_kernel(%arg0: i32, %arg1: i32, %arg2: memref<2x8x128xf32, #tpu.memory_space<vmem>>, %arg3: memref<2x8x128xf32, #tpu.memory_space<vmem>>, %arg4: memref<2x8x128xf32, #tpu.memory_space<vmem>>, %arg5: memref<1x5x8x128xf32, #tpu.memory_space<vmem>>) attributes {dimension_semantics = [#tpu.dimension_semantics<parallel>, #tpu.dimension_semantics<arbitrary>], iteration_bounds = array<i64: 1, 1>, scalar_prefetch = 0 : i64, scratch_operands = 0 : i64, tpu.core_type = #tpu.core_type<tc>, window_params = [{transform_indices = @transform_0, window_bounds = array<i64: 2, 8, 128>}, {transform_indices = @transform_1, window_bounds = array<i64: 2, 8, 128>}, {transform_indices = @transform_2, window_bounds = array<i64: 2, 8, 128>}, {transform_indices = @transform_3, window_bounds = array<i64: 1, 5, 8, 128>}]} {
    %c0_i32 = arith.constant 0 : i32
    %0 = arith.cmpi eq, %arg1, %c0_i32 : i32
    %1 = arith.extui %0 : i1 to i32
    %c0_i32_0 = arith.constant 0 : i32
    %2 = arith.cmpi ne, %1, %c0_i32_0 : i32
    scf.if %2 {
      %cst_50 = arith.constant 0.000000e+00 : f32
      %52 = vector.broadcast %cst_50 : f32 to vector<5x8x128xf32>
      %c0_51 = arith.constant 0 : index
      %c0_52 = arith.constant 0 : index
      %c0_53 = arith.constant 0 : index
      %c0_54 = arith.constant 0 : index
      %53 = vector.load %arg5[%c0_51, %c0_52, %c0_53, %c0_54] : memref<1x5x8x128xf32, #tpu.memory_space<vmem>>, vector<1x5x8x128xf32>
      %54 = vector.shape_cast %53 : vector<1x5x8x128xf32> to vector<5x8x128xf32>
      %55 = vector.shape_cast %52 : vector<5x8x128xf32> to vector<1x5x8x128xf32>
      tpu.vector_store %arg5[%c0_51, %c0_52, %c0_53, %c0_54], %55 {strides = array<i32>} : memref<1x5x8x128xf32, #tpu.memory_space<vmem>>, vector<1x5x8x128xf32>,
    } else {
    }
    %cst = arith.constant 0.000000e+00 : f32
    %3 = vector.broadcast %cst : f32 to vector<8x128xf32>
    %c0 = arith.constant 0 : index
    %c0_1 = arith.constant 0 : index
    %c0_2 = arith.constant 0 : index
    %4 = vector.load %arg2[%c0, %c0_1, %c0_2] : memref<2x8x128xf32, #tpu.memory_space<vmem>>, vector<2x8x128xf32>
    %c0_3 = arith.constant 0 : index
    %c0_4 = arith.constant 0 : index
    %c0_5 = arith.constant 0 : index
    %5 = vector.load %arg3[%c0_3, %c0_4, %c0_5] : memref<2x8x128xf32, #tpu.memory_space<vmem>>, vector<2x8x128xf32>
    %c0_6 = arith.constant 0 : index
    %c0_7 = arith.constant 0 : index
    %c0_8 = arith.constant 0 : index
    %6 = vector.load %arg4[%c0_6, %c0_7, %c0_8] : memref<2x8x128xf32, #tpu.memory_space<vmem>>, vector<2x8x128xf32>
    %7 = arith.mulf %4, %5 : vector<2x8x128xf32>
    %cst_9 = arith.constant dense<0.000000e+00> : vector<8x128xf32>
    %8 = vector.multi_reduction <add>, %7, %cst_9 [0] : vector<2x8x128xf32> to vector<8x128xf32>
    %9 = arith.addf %3, %8 : vector<8x128xf32>
    %10 = arith.mulf %4, %6 : vector<2x8x128xf32>
    %cst_10 = arith.constant dense<0.000000e+00> : vector<8x128xf32>
    %11 = vector.multi_reduction <add>, %10, %cst_10 [0] : vector<2x8x128xf32> to vector<8x128xf32>
    %12 = arith.addf %3, %11 : vector<8x128xf32>
    %13 = arith.mulf %4, %4 : vector<2x8x128xf32>
    %cst_11 = arith.constant dense<0.000000e+00> : vector<8x128xf32>
    %14 = vector.multi_reduction <add>, %13, %cst_11 [0] : vector<2x8x128xf32> to vector<8x128xf32>
    %15 = arith.addf %3, %14 : vector<8x128xf32>
    %16 = arith.mulf %5, %5 : vector<2x8x128xf32>
    %cst_12 = arith.constant dense<0.000000e+00> : vector<8x128xf32>
    %17 = vector.multi_reduction <add>, %16, %cst_12 [0] : vector<2x8x128xf32> to vector<8x128xf32>
    %18 = arith.addf %3, %17 : vector<8x128xf32>
    %19 = arith.mulf %6, %6 : vector<2x8x128xf32>
    %cst_13 = arith.constant dense<0.000000e+00> : vector<8x128xf32>
    %20 = vector.multi_reduction <add>, %19, %cst_13 [0] : vector<2x8x128xf32> to vector<8x128xf32>
    %21 = arith.addf %3, %20 : vector<8x128xf32>
    %c0_14 = arith.constant 0 : index
    %c0_15 = arith.constant 0 : index
    %c0_16 = arith.constant 0 : index
    %c0_17 = arith.constant 0 : index
    %22 = vector.load %arg5[%c0_14, %c0_15, %c0_16, %c0_17] : memref<1x5x8x128xf32, #tpu.memory_space<vmem>>, vector<1x1x8x128xf32>
    %23 = vector.shape_cast %22 : vector<1x1x8x128xf32> to vector<8x128xf32>
    %24 = arith.addf %23, %9 : vector<8x128xf32>
    %c0_18 = arith.constant 0 : index
    %c0_19 = arith.constant 0 : index
    %c0_20 = arith.constant 0 : index
    %c0_21 = arith.constant 0 : index
    %25 = vector.load %arg5[%c0_18, %c0_19, %c0_20, %c0_21] : memref<1x5x8x128xf32, #tpu.memory_space<vmem>>, vector<1x1x8x128xf32>
    %26 = vector.shape_cast %25 : vector<1x1x8x128xf32> to vector<8x128xf32>
    %27 = vector.shape_cast %24 : vector<8x128xf32> to vector<1x1x8x128xf32>
    tpu.vector_store %arg5[%c0_18, %c0_19, %c0_20, %c0_21], %27 {strides = array<i32>} : memref<1x5x8x128xf32, #tpu.memory_space<vmem>>, vector<1x1x8x128xf32>,
    %c0_22 = arith.constant 0 : index
    %c1 = arith.constant 1 : index
    %c0_23 = arith.constant 0 : index
    %c0_24 = arith.constant 0 : index
    %28 = vector.load %arg5[%c0_22, %c1, %c0_23, %c0_24] : memref<1x5x8x128xf32, #tpu.memory_space<vmem>>, vector<1x1x8x128xf32>
    %29 = vector.shape_cast %28 : vector<1x1x8x128xf32> to vector<8x128xf32>
    %30 = arith.addf %29, %12 : vector<8x128xf32>
    %c0_25 = arith.constant 0 : index
    %c1_26 = arith.constant 1 : index
    %c0_27 = arith.constant 0 : index
    %c0_28 = arith.constant 0 : index
    %31 = vector.load %arg5[%c0_25, %c1_26, %c0_27, %c0_28] : memref<1x5x8x128xf32, #tpu.memory_space<vmem>>, vector<1x1x8x128xf32>
    %32 = vector.shape_cast %31 : vector<1x1x8x128xf32> to vector<8x128xf32>
    %33 = vector.shape_cast %30 : vector<8x128xf32> to vector<1x1x8x128xf32>
    tpu.vector_store %arg5[%c0_25, %c1_26, %c0_27, %c0_28], %33 {strides = array<i32>} : memref<1x5x8x128xf32, #tpu.memory_space<vmem>>, vector<1x1x8x128xf32>,
    %c0_29 = arith.constant 0 : index
    %c2 = arith.constant 2 : index
    %c0_30 = arith.constant 0 : index
    %c0_31 = arith.constant 0 : index
    %34 = vector.load %arg5[%c0_29, %c2, %c0_30, %c0_31] : memref<1x5x8x128xf32, #tpu.memory_space<vmem>>, vector<1x1x8x128xf32>
    %35 = vector.shape_cast %34 : vector<1x1x8x128xf32> to vector<8x128xf32>
    %36 = arith.addf %35, %15 : vector<8x128xf32>
    %c0_32 = arith.constant 0 : index
    %c2_33 = arith.constant 2 : index
    %c0_34 = arith.constant 0 : index
    %c0_35 = arith.constant 0 : index
    %37 = vector.load %arg5[%c0_32, %c2_33, %c0_34, %c0_35] : memref<1x5x8x128xf32, #tpu.memory_space<vmem>>, vector<1x1x8x128xf32>
    %38 = vector.shape_cast %37 : vector<1x1x8x128xf32> to vector<8x128xf32>
    %39 = vector.shape_cast %36 : vector<8x128xf32> to vector<1x1x8x128xf32>
    tpu.vector_store %arg5[%c0_32, %c2_33, %c0_34, %c0_35], %39 {strides = array<i32>} : memref<1x5x8x128xf32, #tpu.memory_space<vmem>>, vector<1x1x8x128xf32>,
    %c0_36 = arith.constant 0 : index
    %c3 = arith.constant 3 : index
    %c0_37 = arith.constant 0 : index
    %c0_38 = arith.constant 0 : index
    %40 = vector.load %arg5[%c0_36, %c3, %c0_37, %c0_38] : memref<1x5x8x128xf32, #tpu.memory_space<vmem>>, vector<1x1x8x128xf32>
    %41 = vector.shape_cast %40 : vector<1x1x8x128xf32> to vector<8x128xf32>
    %42 = arith.addf %41, %18 : vector<8x128xf32>
    %c0_39 = arith.constant 0 : index
    %c3_40 = arith.constant 3 : index
    %c0_41 = arith.constant 0 : index
    %c0_42 = arith.constant 0 : index
    %43 = vector.load %arg5[%c0_39, %c3_40, %c0_41, %c0_42] : memref<1x5x8x128xf32, #tpu.memory_space<vmem>>, vector<1x1x8x128xf32>
    %44 = vector.shape_cast %43 : vector<1x1x8x128xf32> to vector<8x128xf32>
    %45 = vector.shape_cast %42 : vector<8x128xf32> to vector<1x1x8x128xf32>
    tpu.vector_store %arg5[%c0_39, %c3_40, %c0_41, %c0_42], %45 {strides = array<i32>} : memref<1x5x8x128xf32, #tpu.memory_space<vmem>>, vector<1x1x8x128xf32>,
    %c0_43 = arith.constant 0 : index
    %c4 = arith.constant 4 : index
    %c0_44 = arith.constant 0 : index
    %c0_45 = arith.constant 0 : index
    %46 = vector.load %arg5[%c0_43, %c4, %c0_44, %c0_45] : memref<1x5x8x128xf32, #tpu.memory_space<vmem>>, vector<1x1x8x128xf32>
    %47 = vector.shape_cast %46 : vector<1x1x8x128xf32> to vector<8x128xf32>
    %48 = arith.addf %47, %21 : vector<8x128xf32>
    %c0_46 = arith.constant 0 : index
    %c4_47 = arith.constant 4 : index
    %c0_48 = arith.constant 0 : index
    %c0_49 = arith.constant 0 : index
    %49 = vector.load %arg5[%c0_46, %c4_47, %c0_48, %c0_49] : memref<1x5x8x128xf32, #tpu.memory_space<vmem>>, vector<1x1x8x128xf32>
    %50 = vector.shape_cast %49 : vector<1x1x8x128xf32> to vector<8x128xf32>
    %51 = vector.shape_cast %48 : vector<8x128xf32> to vector<1x1x8x128xf32>
    tpu.vector_store %arg5[%c0_46, %c4_47, %c0_48, %c0_49], %51 {strides = array<i32>} : memref<1x5x8x128xf32, #tpu.memory_space<vmem>>, vector<1x1x8x128xf32>,
    return
  }
  func.func @transform_0(%arg0: i32, %arg1: i32) -> (i32, i32, i32) {
    %c1_i32 = arith.constant 1 : i32
    %0 = arith.muli %arg0, %c1_i32 : i32
    %1 = arith.addi %0, %arg1 : i32
    %c0_i32 = arith.constant 0 : i32
    %c0_i32_0 = arith.constant 0 : i32
    %c0_i32_1 = arith.constant 0 : i32
    return %1, %c0_i32, %c0_i32_0 : i32, i32, i32
  }
  func.func @transform_1(%arg0: i32, %arg1: i32) -> (i32, i32, i32) {
    %c1_i32 = arith.constant 1 : i32
    %0 = arith.muli %arg0, %c1_i32 : i32
    %1 = arith.addi %0, %arg1 : i32
    %c0_i32 = arith.constant 0 : i32
    %c0_i32_0 = arith.constant 0 : i32
    %c0_i32_1 = arith.constant 0 : i32
    return %1, %c0_i32, %c0_i32_0 : i32, i32, i32
  }
  func.func @transform_2(%arg0: i32, %arg1: i32) -> (i32, i32, i32) {
    %c1_i32 = arith.constant 1 : i32
    %0 = arith.muli %arg0, %c1_i32 : i32
    %1 = arith.addi %0, %arg1 : i32
    %c0_i32 = arith.constant 0 : i32
    %c0_i32_0 = arith.constant 0 : i32
    %c0_i32_1 = arith.constant 0 : i32
    return %1, %c0_i32, %c0_i32_0 : i32, i32, i32
  }
  func.func @transform_3(%arg0: i32, %arg1: i32) -> (i32, i32, i32, i32) {
    %c0_i32 = arith.constant 0 : i32
    %c0_i32_0 = arith.constant 0 : i32
    %c0_i32_1 = arith.constant 0 : i32
    %c0_i32_2 = arith.constant 0 : i32
    return %arg0, %c0_i32, %c0_i32_0, %c0_i32_1 : i32, i32, i32, i32
  }
}

</mosaic_0001>

<bundles_post_ra>
// kernel: tpu_custom_call.1
= control target key start
LH: loop header
LB: loop body
LE: loop exit
PB: predicated region body
PF: predicated region fallthrough
CT: control target
= control target key end

     0   :  { %8 = vsyncpa [#allocation3], 0  ;;  %s313_s0 = inlined_call_operand.hbm [shape: f32[2,8,128], index: 0, kind: input, shape index: {}]   ;;  %s314_s1 = inlined_call_operand.hbm [shape: f32[2,8,128], index: 1, kind: input, shape index: {}]   ;;  %s315_s2 = inlined_call_operand.hbm [shape: f32[2,8,128], index: 2, kind: input, shape index: {}]   ;;  %s316_s3 = inlined_call_operand.hbm [shape: f32[1,5,8,128], index: 3, kind: output, shape index: {}]  }
   0x1   :  { %9 = vsyncpa [#allocation6], 0 }
   0x2   :  { %10 = vsyncpa [#allocation4], 0  ;;  %s36_s14 = sshll.u32 %s314_s1, 4  ;;  %s263_s15 = smov [#allocation5]   ;;  %s37_s14 = int_to_ptr.hbm [resolvable:$true] %s36_s14 }
   0x3   :  { %s38_s16 = sshll.u32 %s263_s15, 4  ;;  %s19_s19 = sshll.u32 %s313_s0, 4  ;;  %s39_s16 = int_to_ptr.vmem [resolvable:$true] %s38_s16  ;;  %s20_s19 = int_to_ptr.hbm [resolvable:$true] %s19_s19 }
   0x4   :  { %s264_s20 = smov 128   ;;  %s265_s21 = smov 8  }
   0x5   :  { %44 = dma.hbm_to_vmem [thread:$0]  %s37_s14, 256, %s39_s16, [#allocation6], %s264_s20, %s264_s20, %s265_s21  }
   0x6   :  { %s266_s22 = smov [#allocation2]   ;;  %s53_s1 = sshll.u32 %s315_s2, 4  ;;  %s54_s1 = int_to_ptr.hbm [resolvable:$true] %s53_s1 }
   0x7   :  { %s21_s23 = sshll.u32 %s266_s22, 4  ;;  %s267_s0 = smov [#allocation7]   ;;  %s22_s23 = int_to_ptr.vmem [resolvable:$true] %s21_s23 }
   0x8   :  { %27 = dma.hbm_to_vmem [thread:$0]  %s20_s19, 256, %s22_s23, [#allocation3], %s264_s20, %s264_s20, %s265_s21  }
   0x9   :  { %s55_s26 = sshll.u32 %s267_s0, 4  ;;  %s56_s26 = int_to_ptr.vmem [resolvable:$true] %s55_s26 }
   0xa   :  { %61 = dma.hbm_to_vmem [thread:$0]  %s54_s1, 256, %s56_s26, [#allocation6], %s264_s20, %s264_s20, %s265_s21  }
   0xb   :  { %257 = dma.done.wait [#allocation3], 256  }
   0xc   :  { %258 = vsyncadd [#allocation3], 4294967040 }
   0xd   :  { %259 = dma.done.wait [#allocation6], 512  }
   0xe   :  { %260 = vsyncadd [#allocation6], 4294966784  ;;  %v89_v0 = vld [vmem:[#allocation2] sm:$0xff]  ;;  %v90_v1 = vld [vmem:[#allocation2 + $0x8] sm:$0xff]  ;;  %s268_s2 = smov [#allocation8]   ;;  %s140_s30 = sshll.u32 %s316_s3, 4  ;;  %s141_s30 = int_to_ptr.hbm [resolvable:$true] %s140_s30 }
   0xf   :  { %v91_v2 = vld [vmem:[#allocation5] sm:$0xff]  ;;  %v92_v3 = vld [vmem:[#allocation5 + $0x8] sm:$0xff]  ;;  %v93_v5 = vld [vmem:[#allocation7] sm:$0xff]  ;;  %v103_v7 = vmul.f32 %v89_v0, %v89_v0  ;;  %v104_v8 = vmul.f32 %v90_v1, %v90_v1  ;;  %s138_s27 = sshll.u32 %s268_s2, 4  ;;  %s139_s27 = int_to_ptr.vmem [resolvable:$true] %s138_s27 }
  0x10   :  { %v95_v4 = vmul.f32 %v91_v2, %v89_v0  ;;  %v94_v6 = vld [vmem:[#allocation7 + $0x8] sm:$0xff]  ;;  %v107_v9 = vmul.f32 %v91_v2, %v91_v2  ;;  %v96_v10 = vmul.f32 %v92_v3, %v90_v1  ;;  %v99_v11 = vmul.f32 %v93_v5, %v89_v0 }
  0x11   :  { %v100_v12 = vmul.f32 %v94_v6, %v90_v1  ;;  %v108_v13 = vmul.f32 %v92_v3, %v92_v3  ;;  %v105_v14 = vadd.f32 %v104_v8, %v103_v7  ;;  %v111_v15 = vmul.f32 %v93_v5, %v93_v5 }
  0x12   :  { %v112_v16 = vmul.f32 %v94_v6, %v94_v6  ;;  %v97_v17 = vadd.f32 %v96_v10, %v95_v4 }
  0x13   :  { %v101_v18 = vadd.f32 %v100_v12, %v99_v11  ;;  %v109_v19 = vadd.f32 %v108_v13, %v107_v9  ;;  %125 = vst [vmem:[#allocation8 + $0x10] sm:$0xff] %v105_v14 }
  0x14   :  { %v113_v20 = vadd.f32 %v112_v16, %v111_v15  ;;  %117 = vst [vmem:[#allocation8] sm:$0xff] %v97_v17 }
  0x15   :  { %121 = vst [vmem:[#allocation8 + $0x8] sm:$0xff] %v101_v18 }
  0x16   :  { %129 = vst [vmem:[#allocation8 + $0x18] sm:$0xff] %v109_v19 }
  0x17   :  { %133 = vst [vmem:[#allocation8 + $0x20] sm:$0xff] %v113_v20 }
  0x18   :  { %146 = dma.vmem_to_hbm [thread:$0]  %s139_s27, 640, %s141_s30, [#allocation4], %s264_s20, %s264_s20, %s265_s21  }
  0x19   :  { %261 = dma.done.wait [#allocation4], 640  }
  0x1a   :  { %262 = vsyncadd [#allocation4], 4294966656 }
  0x1b   :  { %151 = vsyncpa [#allocation3], 1 }
  0x1c   :  { %152 = vsyncpa [#allocation6], 1 }
  0x1d   :  { %153 = vsyncpa [#allocation4], 1 }

</bundles_post_ra>
